<compile_context>
chip_gen: v7x
topology: tpu7x:2x2x1
jax: 0.10.0
libtpu: 0.0.40
codegen_flags: <defaults>
</compile_context>

<pallas_src>
import functools

import jax
import jax.numpy as jnp
from jax import lax
from jax.experimental import pallas as pl
from jax.experimental.pallas import tpu as pltpu


def _linear_kernel(x_ref, w_ref, b_ref, o_ref):
    # x_ref: (TB, D) f32   w_ref: (D, O_pad) bf16   b_ref: (1, O_pad) f32
    # o_ref: (TB, O_pad) f32
    x = x_ref[...].astype(jnp.bfloat16)          # in-kernel cast (VPU, hidden under DMA)
    acc = lax.dot_general(
        x, w_ref[...],
        dimension_numbers=(((1,), (0,)), ((), ())),   # MXU-native: contract D x D
        preferred_element_type=jnp.float32,
    )
    o_ref[...] = acc + b_ref[...]


def prepare_linear_params(weight, bias, lane=128):
    """One-time parameter prep (do NOT call per forward).

    weight: (O, D) PyTorch Linear layout (out_features, in_features), f32
    bias:   (O,) f32
    returns (w_bf16 (D, O_pad) K-major, b_f32 (1, O_pad), O)
    """
    O, D = weight.shape
    o_pad = ((O + lane - 1) // lane) * lane                     # 270 -> 384
    w = jnp.pad(weight.T.astype(jnp.bfloat16), ((0, 0), (0, o_pad - O)))  # (D, O_pad)
    b = jnp.pad(bias.astype(jnp.float32), (0, o_pad - O)).reshape(1, o_pad)
    return w, b, O


def linear_map_forward(x, w_kmajor, b_padded, out_features):
    """Pallas equivalent of LinearMap.forward.

    x:         (B, D) float32, D = channel_in * height * width (already flattened)
    w_kmajor:  (D, O_pad) bf16 from prepare_linear_params
    b_padded:  (1, O_pad) f32  from prepare_linear_params
    returns    (B, out_features) float32
    """
    B, D = x.shape
    O_pad = w_kmajor.shape[1]

    MAX_TB = 512                                  # multiple of 8; VMEM-budget driven
    TB = B if B <= MAX_TB else MAX_TB
    grid = (pl.cdiv(B, TB),)

    out_padded = pl.pallas_call(
        _linear_kernel,
        out_shape=jax.ShapeDtypeStruct((B, O_pad), jnp.float32),
        grid=grid,
        in_specs=[
            pl.BlockSpec((TB, D), lambda i: (i, 0)),       # x tile per grid step
            pl.BlockSpec((D, O_pad), lambda i: (0, 0)),    # weight VMEM-resident
            pl.BlockSpec((1, O_pad), lambda i: (0, 0)),    # bias VMEM-resident
        ],
        out_specs=pl.BlockSpec((TB, O_pad), lambda i: (i, 0)),
        compiler_params=pltpu.CompilerParams(
            # Batch steps are independent; harmless when grid degenerates to (1,).
            dimension_semantics=("parallel",),
        ),
    )(x, w_kmajor, b_padded)

    # Under jit this slice fuses with downstream consumers (no standalone copy).
    return out_padded[:, :out_features]


if __name__ == "__main__":
    # Module hyperparameters (small, consistent with the constructor signature).
    batch = 2
    channel_in, height, width = 4, 16, 16
    in_features = channel_in * height * width   # 1024
    out_features = 270

    key = jax.random.PRNGKey(0)
    kx, kw, kb = jax.random.split(key, 3)

    # Deterministic parameter init mimicking nn.Linear's uniform(-1/sqrt(fan_in), ...).
    bound = 1.0 / (in_features ** 0.5)
    weight = jax.random.uniform(kw, (out_features, in_features),
                                dtype=jnp.float32, minval=-bound, maxval=bound)
    bias = jax.random.uniform(kb, (out_features,),
                              dtype=jnp.float32, minval=-bound, maxval=bound)

    # Input: (B, C, H, W) flattened to (B, C*H*W), as nn.Linear in the module requires.
    x4 = jax.random.normal(kx, (batch, channel_in, height, width), dtype=jnp.float32)
    x = x4.reshape(batch, -1)

    # One-time parameter prep (outside the hot path).
    w_p, b_p, o_feats = prepare_linear_params(weight, bias)

    # jit the forward so the final un-pad slice fuses with the kernel call.
    fwd = jax.jit(functools.partial(linear_map_forward, out_features=o_feats))

    out = fwd(x, w_p, b_p)
    out = jax.block_until_ready(out)

    # Sanity check against plain-JAX f32 reference (bf16 operands -> loose tol).
    ref = (x @ weight.T + bias).astype(jnp.float32)
    assert out.shape == (batch, out_features)
    assert out.dtype == jnp.float32
    assert jnp.allclose(out, ref, atol=3e-2, rtol=3e-2)

    print("KERNEL_OK")
</pallas_src>

<mosaic_0001>
module attributes {stable_mosaic.version = 11 : i64} {
  func.func @_linear_kernel(%arg0: i32, %arg1: memref<2x1024xf32, #tpu.memory_space<vmem>>, %arg2: memref<1024x384xbf16, #tpu.memory_space<vmem>>, %arg3: memref<1x384xf32, #tpu.memory_space<vmem>>, %arg4: memref<2x384xf32, #tpu.memory_space<vmem>>) attributes {dimension_semantics = [#tpu.dimension_semantics<parallel>], iteration_bounds = array<i64: 1>, scalar_prefetch = 0 : i64, scratch_operands = 0 : i64, tpu.core_type = #tpu.core_type<tc>, window_params = [{transform_indices = @transform_0, window_bounds = array<i64: 2, 1024>}, {pipeline_mode = #tpu.pipeline_mode<synchronous>, transform_indices = @transform_1, window_bounds = array<i64: 1024, 384>}, {pipeline_mode = #tpu.pipeline_mode<synchronous>, transform_indices = @transform_2, window_bounds = array<i64: 1, 384>}, {transform_indices = @transform_3, window_bounds = array<i64: 2, 384>}]} {
    %c0 = arith.constant 0 : index
    %c0_0 = arith.constant 0 : index
    %0 = vector.load %arg1[%c0, %c0_0] : memref<2x1024xf32, #tpu.memory_space<vmem>>, vector<2x1024xf32>
    %1 = arith.truncf %0 : vector<2x1024xf32> to vector<2x1024xbf16>
    %c0_1 = arith.constant 0 : index
    %c0_2 = arith.constant 0 : index
    %2 = vector.load %arg2[%c0_1, %c0_2] : memref<1024x384xbf16, #tpu.memory_space<vmem>>, vector<1024x384xbf16>
    %cst = arith.constant dense<0.000000e+00> : vector<2x384xf32>
    %3 = tpu.matmul %1, %2, %cst {dimension_numbers = #tpu.dot_dimension_numbers<[1], [0], [0], [1], [0, 0, 1, 1], [], []>} : vector<2x1024xbf16>, vector<1024x384xbf16>, vector<2x384xf32> -> vector<2x384xf32>
    %c0_3 = arith.constant 0 : index
    %c0_4 = arith.constant 0 : index
    %4 = vector.load %arg3[%c0_3, %c0_4] : memref<1x384xf32, #tpu.memory_space<vmem>>, vector<1x384xf32>
    %5 = vector.broadcast %4 : vector<1x384xf32> to vector<2x384xf32>
    %6 = arith.addf %3, %5 : vector<2x384xf32>
    %c0_5 = arith.constant 0 : index
    %c0_6 = arith.constant 0 : index
    %7 = vector.load %arg4[%c0_5, %c0_6] : memref<2x384xf32, #tpu.memory_space<vmem>>, vector<2x384xf32>
    tpu.vector_store %arg4[%c0_5, %c0_6], %6 {strides = array<i32>} : memref<2x384xf32, #tpu.memory_space<vmem>>, vector<2x384xf32>,
    return
  }
  func.func @transform_0(%arg0: i32) -> (i32, i32) {
    %c0_i32 = arith.constant 0 : i32
    %c0_i32_0 = arith.constant 0 : i32
    return %arg0, %c0_i32 : i32, i32
  }
  func.func @transform_1(%arg0: i32) -> (i32, i32) {
    %c0_i32 = arith.constant 0 : i32
    %c0_i32_0 = arith.constant 0 : i32
    %c0_i32_1 = arith.constant 0 : i32
    return %c0_i32, %c0_i32_0 : i32, i32
  }
  func.func @transform_2(%arg0: i32) -> (i32, i32) {
    %c0_i32 = arith.constant 0 : i32
    %c0_i32_0 = arith.constant 0 : i32
    %c0_i32_1 = arith.constant 0 : i32
    return %c0_i32, %c0_i32_0 : i32, i32
  }
  func.func @transform_3(%arg0: i32) -> (i32, i32) {
    %c0_i32 = arith.constant 0 : i32
    %c0_i32_0 = arith.constant 0 : i32
    return %arg0, %c0_i32 : i32, i32
  }
}

</mosaic_0001>

<bundles_post_ra>
// kernel: linear_map_forward.1
= control target key start
LH: loop header
LB: loop body
LE: loop exit
PB: predicated region body
PF: predicated region fallthrough
CT: control target
= control target key end

     0   :  { %8 = vsyncpa [#allocation3], 0  ;;  %s2504_s0 = inlined_call_operand.hbm [shape: f32[2,1024], index: 0, kind: input, shape index: {}]   ;;  %s2505_s1 = inlined_call_operand.hbm [shape: bf16[1024,384], index: 1, kind: input, shape index: {}]   ;;  %s2506_s2 = inlined_call_operand.vmem [shape: f32[1,384], index: 2, kind: input, shape index: {}]   ;;  %s2507_s3 = inlined_call_operand.hbm [shape: f32[2,384], index: 3, kind: output, shape index: {}]  }
   0x1   :  { %9 = vsyncpa [#allocation6], 0 }
   0x2   :  { %10 = vsyncpa [#allocation4], 0  ;;  %s2382_s12 = smov [#allocation2]   ;;  %s2383_s14 = smov [#allocation5]  }
   0x3   :  { %s17_s13 = sshll.u32 %s2382_s12, 4  ;;  %s26_s15 = sshll.u32 %s2383_s14, 4  ;;  %s18_s13 = int_to_ptr.vmem [resolvable:$true] %s17_s13  ;;  %s2408_s15 = int_to_ptr.vmem [resolvable:$true] %s26_s15 }
   0x4   :  { %s2310_s18 = scalar_lea.hbm %s2504_s0, 256 }
   0x5   :  { %p2311_p0 = scmp.ne.s32.totalorder %s2504_s0, %s2310_s18  ;;  %p2314_p1 = scmp.lt.u32.totalorder %s2310_s18, %s2504_s0 }
   0x7   :  { %p2316_p2 = pnand %p2314_p1, %p2311_p0 }
   0x9   :  { %2319 = shalt.err (!%p2316_p2)
}
   0xa   :  { %s2320_s23 = scalar_lea.vmem %s18_s13, 256  ;;  %p2325_p4 = scmp.lt.s32.totalorder %s18_s13, %s18_s13 }
   0xb   :  { %p2321_p3 = scmp.ne.s32.totalorder %s18_s13, %s2320_s23  ;;  %p2326_p5 = scmp.lt.s32.totalorder %s2320_s23, %s2320_s23 }
   0xd   :  { %p2327_p6 = por %p2326_p5, %p2325_p4 }
   0xf   :  { %p2328_p7 = pnand %p2327_p6, %p2321_p3 }
  0x11   :  { %2331 = shalt.err (!%p2328_p7)
}
  0x12   :  { %20 = dma.hbm_to_vmem [thread:$0]  %s2504_s0, 256, %s18_s13, [#allocation3]  }
  0x13   :  { %s2332_s28 = scalar_lea.hbm %s2505_s1, 24576 }
  0x14   :  { %p2333_p8 = scmp.ne.s32.totalorder %s2505_s1, %s2332_s28  ;;  %p2336_p9 = scmp.lt.u32.totalorder %s2332_s28, %s2505_s1 }
  0x16   :  { %p2338_p10 = pnand %p2336_p9, %p2333_p8 }
  0x18   :  { %2341 = shalt.err (!%p2338_p10)
}
  0x19   :  { %s2342_s6 = scalar_lea.vmem %s2408_s15, 24576  ;;  %p2347_p12 = scmp.lt.s32.totalorder %s2408_s15, %s2408_s15 }
  0x1a   :  { %p2343_p11 = scmp.ne.s32.totalorder %s2408_s15, %s2342_s6  ;;  %p2348_p13 = scmp.lt.s32.totalorder %s2342_s6, %s2342_s6 }
  0x1c   :  { %p2349_p0 = por %p2348_p13, %p2347_p12 }
  0x1e   :  { %p2350_p1 = pnand %p2349_p0, %p2343_p11 }
  0x20   :  { %2353 = shalt.err (!%p2350_p1)
}
  0x21   :  { %s2384_s0 = smov 192   ;;  %s2385_s7 = smov 12  }
  0x22   :  { %32 = dma.hbm_to_vmem [thread:$0]  %s2505_s1, 24576, %s2408_s15, [#allocation6], %s2384_s0, %s2384_s0, %s2385_s7  }
  0x23   :  { %2376 = dma.done.wait [#allocation3], 256  }
  0x24   :  { %2377 = vsyncadd [#allocation3], 4294967040 }
  0x25   :  { %2378 = dma.done.wait [#allocation6], 24576  }
  0x26   :  { %2379 = vsyncadd [#allocation6], 4294942720  ;;  %v2052_v0 = vld [vmem:[#allocation5 + $0x4] ss:$12 sps:$4 sm:$0xff]   ;;  %v2056_v2 = vld [vmem:[#allocation5] ss:$12 sps:$4 sm:$0xff]   ;;  %v50_v38 = vlaneseq }
  0x27   :  { %v2054_v1 = vld [vmem:[#allocation5 + $0x184] ss:$12 sps:$4 sm:$0xff]   ;;  %1393 = vmatprep.subr.bf16.mxu1 %v2052_v0  ;;  %v2057_v3 = vld [vmem:[#allocation5 + $0x180] ss:$12 sps:$4 sm:$0xff]   ;;  %v2058_v4 = vld [vmem:[#allocation5 + $0x1c] ss:$12 sps:$4 sm:$0xff]  }
  0x28   :  { %1434 = vmatprep.subr.bf16.mxu0 %v2054_v1  ;;  %1394 = vmatpush1.bf16.msra.mxu1 %v2056_v2  ;;  %v2060_v5 = vld [vmem:[#allocation5 + $0x19c] ss:$12 sps:$4 sm:$0xff]   ;;  %v2062_v6 = vld [vmem:[#allocation5 + $0x18] ss:$12 sps:$4 sm:$0xff]   ;;  %v2064_v8 = vld [vmem:[#allocation5 + $0x34] ss:$12 sps:$4 sm:$0xff]  }
  0x29   :  { %1435 = vmatpush1.bf16.msra.mxu0 %v2057_v3  ;;  %1395 = vmatprep.subr.bf16.mxu1 %v2058_v4  ;;  %v2063_v7 = vld [vmem:[#allocation5 + $0x198] ss:$12 sps:$4 sm:$0xff]   ;;  %v2066_v9 = vld [vmem:[#allocation5 + $0x1b4] ss:$12 sps:$4 sm:$0xff]   ;;  %v2068_v10 = vld [vmem:[#allocation5 + $0x30] ss:$12 sps:$4 sm:$0xff]  }
  0x2a   :  { %1436 = vmatprep.subr.bf16.mxu0 %v2060_v5  ;;  %v2069_v11 = vld [vmem:[#allocation5 + $0x1b0] ss:$12 sps:$4 sm:$0xff]   ;;  %v2070_v12 = vld [vmem:[#allocation5 + $0x4c] ss:$12 sps:$4 sm:$0xff]   ;;  %v2074_v14 = vld [vmem:[#allocation5 + $0x48] ss:$12 sps:$4 sm:$0xff]  }
  0x2b   :  { %v2072_v13 = vld [vmem:[#allocation5 + $0x1cc] ss:$12 sps:$4 sm:$0xff]   ;;  %v2075_v15 = vld [vmem:[#allocation5 + $0x1c8] ss:$12 sps:$4 sm:$0xff]   ;;  %v2076_v16 = vld [vmem:[#allocation5 + $0x64] ss:$12 sps:$4 sm:$0xff]  }
  0x2c   :  { %1396 = vmatpush1.bf16.msra.mxu1 %v2062_v6  ;;  %v2078_v17 = vld [vmem:[#allocation5 + $0x1e4] ss:$12 sps:$4 sm:$0xff]   ;;  %v2080_v18 = vld [vmem:[#allocation5 + $0x60] ss:$12 sps:$4 sm:$0xff]   ;;  %v2082_v20 = vld [vmem:[#allocation5 + $0x7c] ss:$12 sps:$4 sm:$0xff]  }
  0x2d   :  { %1437 = vmatpush1.bf16.msra.mxu0 %v2063_v7  ;;  %1397 = vmatprep.subr.bf16.mxu1 %v2064_v8  ;;  %v2081_v19 = vld [vmem:[#allocation5 + $0x1e0] ss:$12 sps:$4 sm:$0xff]   ;;  %v2084_v21 = vld [vmem:[#allocation5 + $0x1fc] ss:$12 sps:$4 sm:$0xff]   ;;  %v2086_v22 = vld [vmem:[#allocation5 + $0x78] ss:$12 sps:$4 sm:$0xff]  }
  0x2e   :  { %1438 = vmatprep.subr.bf16.mxu0 %v2066_v9  ;;  %v2087_v23 = vld [vmem:[#allocation5 + $0x1f8] ss:$12 sps:$4 sm:$0xff]   ;;  %v2088_v24 = vld [vmem:[#allocation5 + $0x94] ss:$12 sps:$4 sm:$0xff]   ;;  %v2092_v26 = vld [vmem:[#allocation5 + $0x90] ss:$12 sps:$4 sm:$0xff]  }
  0x2f   :  { %v2090_v25 = vld [vmem:[#allocation5 + $0x214] ss:$12 sps:$4 sm:$0xff]   ;;  %v2093_v27 = vld [vmem:[#allocation5 + $0x210] ss:$12 sps:$4 sm:$0xff]   ;;  %v2094_v28 = vld [vmem:[#allocation5 + $0xac] ss:$12 sps:$4 sm:$0xff]  }
  0x30   :  { %1398 = vmatpush1.bf16.msra.mxu1 %v2068_v10  ;;  %v2096_v29 = vld [vmem:[#allocation5 + $0x22c] ss:$12 sps:$4 sm:$0xff]   ;;  %v2098_v30 = vld [vmem:[#allocation5 + $0xa8] ss:$12 sps:$4 sm:$0xff]   ;;  %v2100_v32 = vld [vmem:[#allocation5 + $0xc4] ss:$12 sps:$4 sm:$0xff]  }
  0x31   :  { %1439 = vmatpush1.bf16.msra.mxu0 %v2069_v11  ;;  %1399 = vmatprep.subr.bf16.mxu1 %v2070_v12  ;;  %v2099_v31 = vld [vmem:[#allocation5 + $0x228] ss:$12 sps:$4 sm:$0xff]   ;;  %v2102_v33 = vld [vmem:[#allocation5 + $0x244] ss:$12 sps:$4 sm:$0xff]   ;;  %v2104_v34 = vld [vmem:[#allocation5 + $0xc0] ss:$12 sps:$4 sm:$0xff]  }
  0x32   :  { %1440 = vmatprep.subr.bf16.mxu0 %v2072_v13  ;;  %v2105_v35 = vld [vmem:[#allocation5 + $0x240] ss:$12 sps:$4 sm:$0xff]   ;;  %v2386_v36 = vmov 1983009808   ;;  %v2106_v39 = vld [vmem:[#allocation5 + $0xdc] ss:$12 sps:$4 sm:$0xff]  }
  0x33   :  { %v48_v37 = vunpack.c.l.s4 %v2386_v36  ;;  %v2108_v40 = vld [vmem:[#allocation5 + $0x25c] ss:$12 sps:$4 sm:$0xff]   ;;  %v2110_v41 = vld [vmem:[#allocation5 + $0xd8] ss:$12 sps:$4 sm:$0xff]   ;;  %v2439_v43 = vshrl.u32 %v50_v38, 7  ;;  %v42_v53 = vld [vmem:[#allocation2] sm:$0xff] }
  0x34   :  { %1400 = vmatpush1.bf16.msra.mxu1 %v2074_v14  ;;  %v2111_v44 = vld [vmem:[#allocation5 + $0x258] ss:$12 sps:$4 sm:$0xff]   ;;  %v2112_v45 = vld [vmem:[#allocation5 + $0xf4] ss:$12 sps:$4 sm:$0xff]   ;;  %v2116_v47 = vld [vmem:[#allocation5 + $0xf0] ss:$12 sps:$4 sm:$0xff]   ;;  %v46_v56 = vcombine.high %v42_v53, %v42_v53 }
  0x35   :  { %1441 = vmatpush1.bf16.msra.mxu0 %v2075_v15  ;;  %1401 = vmatprep.subr.bf16.mxu1 %v2076_v16  ;;  %v49_v42 = vunpack.c.0.s8 %v48_v37  ;;  %v2114_v46 = vld [vmem:[#allocation5 + $0x274] ss:$12 sps:$4 sm:$0xff]   ;;  %v2117_v48 = vld [vmem:[#allocation5 + $0x270] ss:$12 sps:$4 sm:$0xff]   ;;  %v2118_v50 = vld [vmem:[#allocation5 + $0x10c] ss:$12 sps:$4 sm:$0xff]  }
  0x36   :  { %1442 = vmatprep.subr.bf16.mxu0 %v2078_v17  ;;  %v2120_v51 = vld [vmem:[#allocation5 + $0x28c] ss:$12 sps:$4 sm:$0xff]   ;;  %v2122_v52 = vld [vmem:[#allocation5 + $0x108] ss:$12 sps:$4 sm:$0xff]   ;;  %v2124_v57 = vld [vmem:[#allocation5 + $0x124] ss:$12 sps:$4 sm:$0xff]  }
  0x37   :  { %v2442_v49 = vsub.s32 %v49_v42, %v2439_v43  ;;  %v2123_v54 = vld [vmem:[#allocation5 + $0x288] ss:$12 sps:$4 sm:$0xff]   ;;  %v2126_v58 = vld [vmem:[#allocation5 + $0x2a4] ss:$12 sps:$4 sm:$0xff]   ;;  %v2128_v61 = vld [vmem:[#allocation5 + $0x120] ss:$12 sps:$4 sm:$0xff]  }
  0x38   :  { %1402 = vmatpush1.bf16.msra.mxu1 %v2080_v18  ;;  %v2129_v62 = vld [vmem:[#allocation5 + $0x2a0] ss:$12 sps:$4 sm:$0xff]   ;;  %v2130_v1 = vld [vmem:[#allocation5 + $0x13c] ss:$12 sps:$4 sm:$0xff]   ;;  %v2134_v4 = vld [vmem:[#allocation5 + $0x138] ss:$12 sps:$4 sm:$0xff]  }
  0x39   :  { %1443 = vmatpush1.bf16.msra.mxu0 %v2081_v19  ;;  %1403 = vmatprep.subr.bf16.mxu1 %v2082_v20  ;;  %v53_v55 = vrot.slane %v42_v53, %v2442_v49  ;;  %v60_v60 = vrot.slane %v46_v56, %v2442_v49  ;;  %v2132_v2 = vld [vmem:[#allocation5 + $0x2bc] ss:$12 sps:$4 sm:$0xff]   ;;  %v2135_v5 = vld [vmem:[#allocation5 + $0x2b8] ss:$12 sps:$4 sm:$0xff]   ;;  %v2136_v6 = vld [vmem:[#allocation5 + $0x154] ss:$12 sps:$4 sm:$0xff]  }
  0x3a   :  { %1444 = vmatprep.subr.bf16.mxu0 %v2084_v21  ;;  %v2138_v7 = vld [vmem:[#allocation5 + $0x2d4] ss:$12 sps:$4 sm:$0xff]   ;;  %v2140_v8 = vld [vmem:[#allocation5 + $0x150] ss:$12 sps:$4 sm:$0xff]   ;;  %v2142_v10 = vld [vmem:[#allocation5 + $0x16c] ss:$12 sps:$4 sm:$0xff]  }
  0x3b   :  { %v61_v59 = vcombine.high %v53_v55, %v53_v55  ;;  %v62_v0 = vcombine.high %v60_v60, %v60_v60  ;;  %v2141_v9 = vld [vmem:[#allocation5 + $0x2d0] ss:$12 sps:$4 sm:$0xff]   ;;  %v2144_v11 = vld [vmem:[#allocation5 + $0x2ec] ss:$12 sps:$4 sm:$0xff]   ;;  %v2146_v12 = vld [vmem:[#allocation5 + $0x168] ss:$12 sps:$4 sm:$0xff]   ;;  %v2449_v17 = vpack.c.bf16 %v53_v55, %v53_v55  ;;  %v2451_v18 = vpack.c.bf16 %v60_v60, %v60_v60 }
  0x3c   :  { %1404 = vmatpush1.bf16.msra.mxu1 %v2086_v22  ;;  %v2147_v13 = vld [vmem:[#allocation5 + $0x2e8] ss:$12 sps:$4 sm:$0xff]   ;;  %v2151_v14 = vld [vmem:[#allocation5 + $0x304] ss:$12 sps:$4 sm:$0xff]   ;;  %v2149_v16 = vld [vmem:[#allocation5 + $0x300] ss:$12 sps:$4 sm:$0xff]  }
  0x3d   :  { %1445 = vmatpush1.bf16.msra.mxu0 %v2087_v23  ;;  %1405 = vmatprep.subr.bf16.mxu1 %v2088_v24  ;;  %v89_v63 = vpack.c.bf16 %v61_v59, %v61_v59  ;;  %v2446_v3 = vpack.c.bf16 %v62_v0, %v62_v0  ;;  %v2152_v15 = vld [vmem:[#allocation5 + $0xc8] ss:$12 sps:$4 sm:$0xff]   ;;  %v2157_v21 = vld [vmem:[#allocation5 + $0xe0] ss:$12 sps:$4 sm:$0xff]   ;;  %v2154_v22 = vld [vmem:[#allocation5 + $0x318] ss:$12 sps:$4 sm:$0xff]  }
  0x3e   :  { %1446 = vmatprep.subr.bf16.mxu0 %v2090_v25  ;;  %v2153_v19 = vld [vmem:[#allocation5 + $0x8] ss:$12 sps:$4 sm:$0xff]   ;;  %v2158_v23 = vld [vmem:[#allocation5 + $0x20] ss:$12 sps:$4 sm:$0xff]   ;;  %v2162_v25 = vld [vmem:[#allocation5 + $0xf8] ss:$12 sps:$4 sm:$0xff]  }
  0x3f   :  { %1425 = vmatprep.mubr.bf16.mxu1 %v89_v63  ;;  %1466 = vmatprep.mubr.bf16.mxu0 %v2446_v3  ;;  %v2156_v20 = vld [vmem:[#allocation5 + $0x31c] ss:$12 sps:$4 sm:$0xff]   ;;  %v2161_v24 = vld [vmem:[#allocation5 + $0x334] ss:$12 sps:$4 sm:$0xff]   ;;  %v2174_v38 = vld [vmem:[#allocation5 + $0x378] ss:$12 sps:$4 sm:$0xff]  }
  0x40   :  { %1406 = vmatpush1.bf16.msra.mxu1 %v2092_v26  ;;  %v2159_v26 = vld [vmem:[#allocation5 + $0x330] ss:$12 sps:$4 sm:$0xff]   ;;  %v2177_v37 = vld [vmem:[#allocation5 + $0x140] ss:$12 sps:$4 sm:$0xff]   ;;  %v2193_v53 = vld [vmem:[#allocation5 + $0x188] ss:$12 sps:$4 sm:$0xff]  }
  0x41   :  { %1447 = vmatpush1.bf16.msra.mxu0 %v2093_v27  ;;  %1407 = vmatprep.subr.bf16.mxu1 %v2094_v28  ;;  %v2163_v27 = vld [vmem:[#allocation5 + $0x38] ss:$12 sps:$4 sm:$0xff]   ;;  %v2176_v36 = vld [vmem:[#allocation5 + $0x37c] ss:$12 sps:$4 sm:$0xff]   ;;  %v2197_v56 = vld [vmem:[#allocation5 + $0x260] ss:$12 sps:$4 sm:$0xff]  }
  0x42   :  { %1448 = vmatprep.subr.bf16.mxu0 %v2096_v29  ;;  %v2166_v28 = vld [vmem:[#allocation5 + $0x34c] ss:$12 sps:$4 sm:$0xff]   ;;  %v2167_v29 = vld [vmem:[#allocation5 + $0x110] ss:$12 sps:$4 sm:$0xff]  }
  0x43   :  { %v2179_v42 = vld [vmem:[#allocation5 + $0x390] ss:$12 sps:$4 sm:$0xff]   ;;  %v2198_v59 = vld [vmem:[#allocation5 + $0x1a0] ss:$12 sps:$4 sm:$0xff]  }
  0x44   :  { %1408 = vmatpush1.bf16.msra.mxu1 %v2098_v30  ;;  %v2164_v30 = vld [vmem:[#allocation5 + $0x348] ss:$12 sps:$4 sm:$0xff]   ;;  %v2199_v0 = vld [vmem:[#allocation5 + $0x3f0] ss:$12 sps:$4 sm:$0xff]  }
  0x45   :  { %1449 = vmatpush1.bf16.msra.mxu0 %v2099_v31  ;;  %1409 = vmatprep.subr.bf16.mxu1 %v2100_v32  ;;  %v2168_v31 = vld [vmem:[#allocation5 + $0x50] ss:$12 sps:$4 sm:$0xff]  }
  0x46   :  { %1450 = vmatprep.subr.bf16.mxu0 %v2102_v33  ;;  %v2171_v32 = vld [vmem:[#allocation5 + $0x364] ss:$12 sps:$4 sm:$0xff]   ;;  %v2172_v33 = vld [vmem:[#allocation5 + $0x128] ss:$12 sps:$4 sm:$0xff]  }
  0x47   :  { %v2196_v55 = vld [vmem:[#allocation5 + $0x3dc] ss:$12 sps:$4 sm:$0xff]  }
  0x48   :  { %1410 = vmatpush1.bf16.msra.mxu1 %v2104_v34  ;;  %v2169_v34 = vld [vmem:[#allocation5 + $0x360] ss:$12 sps:$4 sm:$0xff]  }
  0x49   :  { %1451 = vmatpush1.bf16.msra.mxu0 %v2105_v35  ;;  %1411 = vmatprep.subr.bf16.mxu1 %v2106_v39  ;;  %v2173_v35 = vld [vmem:[#allocation5 + $0x68] ss:$12 sps:$4 sm:$0xff]   ;;  %v2178_v39 = vld [vmem:[#allocation5 + $0x80] ss:$12 sps:$4 sm:$0xff]  }
  0x4a   :  { %1452 = vmatprep.subr.bf16.mxu0 %v2108_v40  ;;  %v2181_v40 = vld [vmem:[#allocation5 + $0x394] ss:$12 sps:$4 sm:$0xff]  }
  0x4c   :  { %1412 = vmatpush1.bf16.msra.mxu1 %v2110_v41  ;;  %v2182_v41 = vld [vmem:[#allocation5 + $0x158] ss:$12 sps:$4 sm:$0xff]  }
  0x4d   :  { %1453 = vmatpush1.bf16.msra.mxu0 %v2111_v44  ;;  %1413 = vmatprep.subr.bf16.mxu1 %v2112_v45  ;;  %v2183_v44 = vld [vmem:[#allocation5 + $0x98] ss:$12 sps:$4 sm:$0xff]  }
  0x4e   :  { %1454 = vmatprep.subr.bf16.mxu0 %v2114_v46  ;;  %v2186_v45 = vld [vmem:[#allocation5 + $0x3ac] ss:$12 sps:$4 sm:$0xff]   ;;  %v2187_v46 = vld [vmem:[#allocation5 + $0x170] ss:$12 sps:$4 sm:$0xff]  }
  0x50   :  { %1414 = vmatpush1.bf16.msra.mxu1 %v2116_v47  ;;  %v2184_v47 = vld [vmem:[#allocation5 + $0x3a8] ss:$12 sps:$4 sm:$0xff]  }
  0x51   :  { %1455 = vmatpush1.bf16.msra.mxu0 %v2117_v48  ;;  %1415 = vmatprep.subr.bf16.mxu1 %v2118_v50  ;;  %v2188_v48 = vld [vmem:[#allocation5 + $0xb0] ss:$12 sps:$4 sm:$0xff]  }
  0x52   :  { %1456 = vmatprep.subr.bf16.mxu0 %v2120_v51  ;;  %v2191_v50 = vld [vmem:[#allocation5 + $0x3c4] ss:$12 sps:$4 sm:$0xff]   ;;  %v2192_v51 = vld [vmem:[#allocation5 + $0x248] ss:$12 sps:$4 sm:$0xff]  }
  0x54   :  { %1416 = vmatpush1.bf16.msra.mxu1 %v2122_v52  ;;  %v2189_v52 = vld [vmem:[#allocation5 + $0x3c0] ss:$12 sps:$4 sm:$0xff]  }
  0x55   :  { %1457 = vmatpush1.bf16.msra.mxu0 %v2123_v54  ;;  %1417 = vmatprep.subr.bf16.mxu1 %v2124_v57  ;;  %v43_v54 = vld [vmem:[#allocation2 + $0x8] sm:$0xff] }
  0x56   :  { %1458 = vmatprep.subr.bf16.mxu0 %v2126_v58  ;;  %v2456_v57 = vrot.slane %v43_v54, %v2442_v49  ;;  %v2194_v58 = vld [vmem:[#allocation5 + $0x3d8] ss:$12 sps:$4 sm:$0xff]  }
  0x58   :  { %1418 = vmatpush1.bf16.msra.mxu1 %v2128_v61  ;;  %v78_v60 = vcombine.high %v2456_v57, %v2456_v57  ;;  %v2201_v61 = vld [vmem:[#allocation5 + $0x3f4] ss:$12 sps:$4 sm:$0xff]  }
  0x59   :  { %1459 = vmatpush1.bf16.msra.mxu0 %v2129_v62  ;;  %1419 = vmatprep.subr.bf16.mxu1 %v2130_v1  ;;  %v2202_v62 = vld [vmem:[#allocation5 + $0x278] ss:$12 sps:$4 sm:$0xff]  }
  0x5a   :  { %1460 = vmatprep.subr.bf16.mxu0 %v2132_v2  ;;  %v2203_v1 = vld [vmem:[#allocation5 + $0x1b8] ss:$12 sps:$4 sm:$0xff]  }
  0x5b   :  { %v2206_v2 = vld [vmem:[#allocation5 + $0x40c] ss:$12 sps:$4 sm:$0xff]  }
  0x5c   :  { %1420 = vmatpush1.bf16.msra.mxu1 %v2134_v4  ;;  %v2207_v4 = vld [vmem:[#allocation5 + $0x290] ss:$12 sps:$4 sm:$0xff]  }
  0x5d   :  { %1461 = vmatpush1.bf16.msra.mxu0 %v2135_v5  ;;  %1421 = vmatprep.subr.bf16.mxu1 %v2136_v6  ;;  %v2204_v5 = vld [vmem:[#allocation5 + $0x408] ss:$12 sps:$4 sm:$0xff]   ;;  %v2208_v6 = vld [vmem:[#allocation5 + $0x1d0] ss:$12 sps:$4 sm:$0xff]  }
  0x5e   :  { %1462 = vmatprep.subr.bf16.mxu0 %v2138_v7  ;;  %v2211_v7 = vld [vmem:[#allocation5 + $0x424] ss:$12 sps:$4 sm:$0xff]  }
  0x60   :  { %1422 = vmatpush1.bf16.msra.mxu1 %v2140_v8  ;;  %v2212_v8 = vld [vmem:[#allocation5 + $0x2a8] ss:$12 sps:$4 sm:$0xff]  }
  0x61   :  { %1463 = vmatpush1.bf16.msra.mxu0 %v2141_v9  ;;  %1423 = vmatprep.subr.bf16.mxu1 %v2142_v10  ;;  %v2209_v9 = vld [vmem:[#allocation5 + $0x420] ss:$12 sps:$4 sm:$0xff]   ;;  %v2216_v10 = vld [vmem:[#allocation5 + $0x43c] ss:$12 sps:$4 sm:$0xff]  }
  0x62   :  { %1464 = vmatprep.subr.bf16.mxu0 %v2144_v11  ;;  %v2217_v11 = vld [vmem:[#allocation5 + $0x2c0] ss:$12 sps:$4 sm:$0xff]  }
  0x64   :  { %1424 = vmatpush1.bf16.msra.mxu1 %v2146_v12  ;;  %v2214_v12 = vld [vmem:[#allocation5 + $0x438] ss:$12 sps:$4 sm:$0xff]  }
  0x65   :  { %1465 = vmatpush1.bf16.msra.mxu0 %v2147_v13  ;;  %1946 = vmatprep.subr.bf16.mxu1 %v2152_v15  ;;  %v2218_v13 = vld [vmem:[#allocation5 + $0x200] ss:$12 sps:$4 sm:$0xff]   ;;  %v2222_v15 = vld [vmem:[#allocation5 + $0x2d8] ss:$12 sps:$4 sm:$0xff]  }
  0x66   :  { %1475 = vmatprep.subr.bf16.mxu0 %v2151_v14  ;;  %v2221_v14 = vld [vmem:[#allocation5 + $0x454] ss:$12 sps:$4 sm:$0xff]  }
  0x67   :  { %1426 = vmatmul.mubr.bf16.vlgmr.msra.gmra.mrb[0].mxu1 %v2449_v17 }
  0x68   :  { %1467 = vmatmul.mubr.bf16.vlgmr.msra.gmra.mrb[0].mxu0 %v2451_v18  ;;  %1947 = vmatpush3.bf16.msra.mxu1 %v2153_v19  ;;  %v2223_v19 = vld [vmem:[#allocation5 + $0x218] ss:$12 sps:$4 sm:$0xff]  }
  0x69   :  { %1476 = vmatpush1.bf16.msra.mxu0 %v2149_v16  ;;  %1948 = vmatprep.subr.bf16.mxu1 %v2157_v21  ;;  %v2219_v16 = vld [vmem:[#allocation5 + $0x450] ss:$12 sps:$4 sm:$0xff]  }
  0x6a   :  { %1477 = vmatprep.subr.bf16.mxu0 %v2156_v20  ;;  %1589 = vmatprep.mubr.bf16.mxu1 %v89_v63  ;;  %v2461_v63 = vpack.c.bf16 %v78_v60, %v78_v60  ;;  %v2226_v20 = vld [vmem:[#allocation5 + $0x46c] ss:$12 sps:$4 sm:$0xff]   ;;  %v2227_v21 = vld [vmem:[#allocation5 + $0x2f0] ss:$12 sps:$4 sm:$0xff]  }
  0x6b   :  { %v2268_v60 = vld [vmem:[#allocation5 + $0x3b0] ss:$12 sps:$4 sm:$0xff]  }
  0x6c   :  { %1949 = vmatpush3.bf16.msra.mxu1 %v2158_v23  ;;  %1507 = vmatprep.mubr.bf16.mxu0 %v2461_v63  ;;  %v2224_v23 = vld [vmem:[#allocation5 + $0x468] ss:$12 sps:$4 sm:$0xff]  }
  0x6d   :  { %1478 = vmatpush1.bf16.msra.mxu0 %v2154_v22  ;;  %1950 = vmatprep.subr.bf16.mxu1 %v2162_v25  ;;  %v2231_v25 = vld [vmem:[#allocation5 + $0x484] ss:$12 sps:$4 sm:$0xff]  }
  0x6e   :  { %1479 = vmatprep.subr.bf16.mxu0 %v2161_v24  ;;  %v2228_v24 = vld [vmem:[#allocation5 + $0x230] ss:$12 sps:$4 sm:$0xff]  }
  0x70   :  { %1951 = vmatpush3.bf16.msra.mxu1 %v2163_v27 }
  0x71   :  { %1480 = vmatpush1.bf16.msra.mxu0 %v2159_v26  ;;  %1952 = vmatprep.subr.bf16.mxu1 %v2167_v29  ;;  %v2232_v26 = vld [vmem:[#allocation5 + $0x3c8] ss:$12 sps:$4 sm:$0xff]   ;;  %v2472_v29 = vpack.c.bf16 %v2456_v57, %v2456_v57  ;;  %v2266_v57 = vld [vmem:[#allocation5 + $0x52c] ss:$12 sps:$4 sm:$0xff]  }
  0x72   :  { %1481 = vmatprep.subr.bf16.mxu0 %v2166_v28  ;;  %v2229_v28 = vld [vmem:[#allocation5 + $0x480] ss:$12 sps:$4 sm:$0xff]  }
  0x74   :  { %1953 = vmatpush3.bf16.msra.mxu1 %v2168_v31  ;;  %v2236_v31 = vld [vmem:[#allocation5 + $0x49c] ss:$12 sps:$4 sm:$0xff]  }
  0x75   :  { %1482 = vmatpush1.bf16.msra.mxu0 %v2164_v30  ;;  %1954 = vmatprep.subr.bf16.mxu1 %v2172_v33  ;;  %v2233_v30 = vld [vmem:[#allocation5 + $0x308] ss:$12 sps:$4 sm:$0xff]   ;;  %v2234_v33 = vld [vmem:[#allocation5 + $0x498] ss:$12 sps:$4 sm:$0xff]  }
  0x76   :  { %1483 = vmatprep.subr.bf16.mxu0 %v2171_v32  ;;  %v2237_v32 = vld [vmem:[#allocation5 + $0x3e0] ss:$12 sps:$4 sm:$0xff]  }
  0x78   :  { %1955 = vmatpush3.bf16.msra.mxu1 %v2173_v35  ;;  %v2238_v35 = vld [vmem:[#allocation5 + $0x320] ss:$12 sps:$4 sm:$0xff]  }
  0x79   :  { %1484 = vmatpush1.bf16.msra.mxu0 %v2169_v34  ;;  %1956 = vmatprep.subr.bf16.mxu1 %v2177_v37  ;;  %v2242_v37 = vld [vmem:[#allocation5 + $0x3f8] ss:$12 sps:$4 sm:$0xff]  }
  0x7a   :  { %1485 = vmatprep.subr.bf16.mxu0 %v2176_v36  ;;  %v2241_v36 = vld [vmem:[#allocation5 + $0x4b4] ss:$12 sps:$4 sm:$0xff]  }
  0x7c   :  { %1957 = vmatpush3.bf16.msra.mxu1 %v2178_v39  ;;  %v2243_v39 = vld [vmem:[#allocation5 + $0x338] ss:$12 sps:$4 sm:$0xff]  }
  0x7d   :  { %1486 = vmatpush1.bf16.msra.mxu0 %v2174_v38  ;;  %1958 = vmatprep.subr.bf16.mxu1 %v2182_v41  ;;  %v2239_v38 = vld [vmem:[#allocation5 + $0x4b0] ss:$12 sps:$4 sm:$0xff]   ;;  %v2244_v41 = vld [vmem:[#allocation5 + $0x4c8] ss:$12 sps:$4 sm:$0xff]  }
  0x7e   :  { %1487 = vmatprep.subr.bf16.mxu0 %v2181_v40  ;;  %v2247_v40 = vld [vmem:[#allocation5 + $0x410] ss:$12 sps:$4 sm:$0xff]  }
  0x80   :  { %1959 = vmatpush3.bf16.msra.mxu1 %v2183_v44  ;;  %v2251_v44 = vld [vmem:[#allocation5 + $0x4e4] ss:$12 sps:$4 sm:$0xff]  }
  0x81   :  { %1488 = vmatpush1.bf16.msra.mxu0 %v2179_v42  ;;  %1960 = vmatprep.subr.bf16.mxu1 %v2187_v46  ;;  %v2248_v42 = vld [vmem:[#allocation5 + $0x350] ss:$12 sps:$4 sm:$0xff]   ;;  %v2249_v46 = vld [vmem:[#allocation5 + $0x4e0] ss:$12 sps:$4 sm:$0xff]  }
  0x82   :  { %1489 = vmatprep.subr.bf16.mxu0 %v2186_v45  ;;  %v2252_v45 = vld [vmem:[#allocation5 + $0x428] ss:$12 sps:$4 sm:$0xff]  }
  0x84   :  { %1961 = vmatpush3.bf16.msra.mxu1 %v2188_v48  ;;  %v2256_v48 = vld [vmem:[#allocation5 + $0x4fc] ss:$12 sps:$4 sm:$0xff]  }
  0x85   :  { %1490 = vmatpush1.bf16.msra.mxu0 %v2184_v47  ;;  %1968 = vmatprep.subr.bf16.mxu1 %v2192_v51  ;;  %v2253_v47 = vld [vmem:[#allocation5 + $0x368] ss:$12 sps:$4 sm:$0xff]   ;;  %v2254_v51 = vld [vmem:[#allocation5 + $0x4f8] ss:$12 sps:$4 sm:$0xff]  }
  0x86   :  { %1491 = vmatprep.subr.bf16.mxu0 %v2191_v50  ;;  %v2257_v50 = vld [vmem:[#allocation5 + $0x440] ss:$12 sps:$4 sm:$0xff]  }
  0x87   :  { %1590 = vmatmul.mubr.bf16.vlgmr.msra.gmra.mrb[4].mxu1 %v2449_v17  ;;  %v63_v17 = vcombine.high %v43_v54, %v43_v54  ;;  %v2262_v54 = vld [vmem:[#allocation5 + $0x458] ss:$12 sps:$4 sm:$0xff]  }
  0x88   :  { %1969 = vmatpush3.bf16.msra.mxu1 %v2193_v53  ;;  %1629 = vmatprep.mubr.bf16.mxu1 %v2446_v3  ;;  %v2213_v3 = vld [vmem:[#allocation5 + $0x1e8] ss:$12 sps:$4 sm:$0xff]  }
  0x89   :  { %1492 = vmatpush1.bf16.msra.mxu0 %v2189_v52  ;;  %1970 = vmatprep.subr.bf16.mxu1 %v2197_v56  ;;  %v2466_v22 = vrot.slane %v63_v17, %v2442_v49  ;;  %v2258_v52 = vld [vmem:[#allocation5 + $0x380] ss:$12 sps:$4 sm:$0xff]   ;;  %v2263_v56 = vld [vmem:[#allocation5 + $0x398] ss:$12 sps:$4 sm:$0xff]   ;;  %v2296_v17 = vld [vmem:[#allocation5 + $0x5bc] ss:$12 sps:$4 sm:$0xff]  }
  0x8a   :  { %1493 = vmatprep.subr.bf16.mxu0 %v2196_v55  ;;  %v2261_v53 = vld [vmem:[#allocation5 + $0x514] ss:$12 sps:$4 sm:$0xff]   ;;  %v2259_v55 = vld [vmem:[#allocation5 + $0x510] ss:$12 sps:$4 sm:$0xff]  }
  0x8b   :  { %v79_v27 = vcombine.high %v2466_v22, %v2466_v22 }
  0x8c   :  { %1971 = vmatpush3.bf16.msra.mxu1 %v2198_v59  ;;  %v2264_v59 = vld [vmem:[#allocation5 + $0x528] ss:$12 sps:$4 sm:$0xff]  }
  0x8d   :  { %1494 = vmatpush1.bf16.msra.mxu0 %v2194_v58  ;;  %1972 = vmatprep.subr.bf16.mxu1 %v2202_v62  ;;  %v2474_v34 = vpack.c.bf16 %v79_v27, %v79_v27  ;;  %v2267_v58 = vld [vmem:[#allocation5 + $0x470] ss:$12 sps:$4 sm:$0xff]   ;;  %v2272_v62 = vld [vmem:[#allocation5 + $0x548] ss:$12 sps:$4 sm:$0xff]   ;;  %v2306_v27 = vld [vmem:[#allocation5 + $0x5ec] ss:$12 sps:$4 sm:$0xff]  }
  0x8e   :  { %1495 = vmatprep.subr.bf16.mxu0 %v2201_v61  ;;  %v2271_v61 = vld [vmem:[#allocation5 + $0x544] ss:$12 sps:$4 sm:$0xff]  }
  0x90   :  { %1973 = vmatpush3.bf16.msra.mxu1 %v2203_v1  ;;  %v2276_v1 = vld [vmem:[#allocation5 + $0x55c] ss:$12 sps:$4 sm:$0xff]  }
  0x91   :  { %1496 = vmatpush1.bf16.msra.mxu0 %v2199_v0  ;;  %1974 = vmatprep.subr.bf16.mxu1 %v2207_v4  ;;  %v2273_v0 = vld [vmem:[#allocation5 + $0x488] ss:$12 sps:$4 sm:$0xff]   ;;  %v2274_v4 = vld [vmem:[#allocation5 + $0x558] ss:$12 sps:$4 sm:$0xff]  }
  0x92   :  { %1497 = vmatprep.subr.bf16.mxu0 %v2206_v2  ;;  %v2277_v2 = vld [vmem:[#allocation5 + $0x560] ss:$12 sps:$4 sm:$0xff]  }
  0x94   :  { %1975 = vmatpush3.bf16.msra.mxu1 %v2208_v6  ;;  %v2281_v6 = vld [vmem:[#allocation5 + $0x574] ss:$12 sps:$4 sm:$0xff]  }
  0x95   :  { %1498 = vmatpush1.bf16.msra.mxu0 %v2204_v5  ;;  %1976 = vmatprep.subr.bf16.mxu1 %v2212_v8  ;;  %v2278_v5 = vld [vmem:[#allocation5 + $0x4a0] ss:$12 sps:$4 sm:$0xff]   ;;  %v2279_v8 = vld [vmem:[#allocation5 + $0x570] ss:$12 sps:$4 sm:$0xff]  }
  0x96   :  { %1499 = vmatprep.subr.bf16.mxu0 %v2211_v7  ;;  %v2282_v7 = vld [vmem:[#allocation5 + $0x578] ss:$12 sps:$4 sm:$0xff]  }
  0x98   :  { %1977 = vmatpush3.bf16.msra.mxu1 %v2213_v3  ;;  %v2286_v3 = vld [vmem:[#allocation5 + $0x58c] ss:$12 sps:$4 sm:$0xff]  }
  0x99   :  { %1500 = vmatpush1.bf16.msra.mxu0 %v2209_v9  ;;  %1978 = vmatprep.subr.bf16.mxu1 %v2217_v11  ;;  %v2283_v9 = vld [vmem:[#allocation5 + $0x4b8] ss:$12 sps:$4 sm:$0xff]   ;;  %v2284_v11 = vld [vmem:[#allocation5 + $0x588] ss:$12 sps:$4 sm:$0xff]  }
  0x9a   :  { %1501 = vmatprep.subr.bf16.mxu0 %v2216_v10  ;;  %v2287_v10 = vld [vmem:[#allocation5 + $0x590] ss:$12 sps:$4 sm:$0xff]  }
  0x9c   :  { %1979 = vmatpush3.bf16.msra.mxu1 %v2218_v13  ;;  %v2291_v13 = vld [vmem:[#allocation5 + $0x5a4] ss:$12 sps:$4 sm:$0xff]  }
  0x9d   :  { %1502 = vmatpush1.bf16.msra.mxu0 %v2214_v12  ;;  %1980 = vmatprep.subr.bf16.mxu1 %v2222_v15  ;;  %v2288_v12 = vld [vmem:[#allocation5 + $0x4d0] ss:$12 sps:$4 sm:$0xff]   ;;  %v2289_v15 = vld [vmem:[#allocation5 + $0x5a0] ss:$12 sps:$4 sm:$0xff]  }
  0x9e   :  { %1503 = vmatprep.subr.bf16.mxu0 %v2221_v14  ;;  %v2292_v14 = vld [vmem:[#allocation5 + $0x5a8] ss:$12 sps:$4 sm:$0xff]  }
  0xa0   :  { %1981 = vmatpush3.bf16.msra.mxu1 %v2223_v19  ;;  %v2297_v19 = vld [vmem:[#allocation5 + $0x5c0] ss:$12 sps:$4 sm:$0xff]  }
  0xa1   :  { %1504 = vmatpush1.bf16.msra.mxu0 %v2219_v16  ;;  %1982 = vmatprep.subr.bf16.mxu1 %v2227_v21  ;;  %v2293_v16 = vld [vmem:[#allocation5 + $0x4e8] ss:$12 sps:$4 sm:$0xff]   ;;  %v2298_v21 = vld [vmem:[#allocation5 + $0x500] ss:$12 sps:$4 sm:$0xff]  }
  0xa2   :  { %1505 = vmatprep.subr.bf16.mxu0 %v2226_v20  ;;  %v2294_v20 = vld [vmem:[#allocation5 + $0x5b8] ss:$12 sps:$4 sm:$0xff]  }
  0xa4   :  { %1983 = vmatpush3.bf16.msra.mxu1 %v2228_v24  ;;  %v2302_v24 = vld [vmem:[#allocation5 + $0x5d8] ss:$12 sps:$4 sm:$0xff]  }
  0xa5   :  { %1506 = vmatpush1.bf16.msra.mxu0 %v2224_v23  ;;  %1990 = vmatprep.subr.bf16.mxu1 %v2232_v26  ;;  %v2301_v23 = vld [vmem:[#allocation5 + $0x5d4] ss:$12 sps:$4 sm:$0xff]   ;;  %v2303_v26 = vld [vmem:[#allocation5 + $0x518] ss:$12 sps:$4 sm:$0xff]  }
  0xa6   :  { %1516 = vmatprep.subr.bf16.mxu0 %v2231_v25  ;;  %v2299_v25 = vld [vmem:[#allocation5 + $0x5d0] ss:$12 sps:$4 sm:$0xff]  }
  0xa7   :  { %1630 = vmatmul.mubr.bf16.vlgmr.msra.gmra.mrb[8].mxu1 %v2451_v18  ;;  %v2246_v18 = vld [vmem:[#allocation5 + $0x4cc] ss:$12 sps:$4 sm:$0xff]  }
  0xa8   :  { %1508 = vmatmul.mubr.bf16.vlgmr.msra.gmra.mrb[0].mxu0 %v2472_v29  ;;  %1991 = vmatpush3.bf16.msra.mxu1 %v2233_v30  ;;  %v2308_v30 = vld [vmem:[#allocation5 + $0x530] ss:$12 sps:$4 sm:$0xff]  }
  0xa9   :  { %1517 = vmatpush1.bf16.msra.mxu0 %v2229_v28  ;;  %1992 = vmatprep.subr.bf16.mxu1 %v2237_v32  ;;  %v2307_v28 = vld [vmem:[#allocation5 + $0x5f0] ss:$12 sps:$4 sm:$0xff]  }
  0xaa   :  { %1518 = vmatprep.subr.bf16.mxu0 %v2236_v31  ;;  %1669 = vmatprep.mubr.bf16.mxu1 %v2461_v63  ;;  %v2269_v63 = vld [vmem:[#allocation5 + $0x540] ss:$12 sps:$4 sm:$0xff]   ;;  %v94_v31 = vpack.c.bf16 %v2466_v22, %v2466_v22 }
  0xab   :  { %1548 = vmatprep.mubr.bf16.mxu0 %v2474_v34 }
  0xac   :  { %1993 = vmatpush3.bf16.msra.mxu1 %v2238_v35 }
  0xad   :  { %1519 = vmatpush1.bf16.msra.mxu0 %v2234_v33  ;;  %1994 = vmatprep.subr.bf16.mxu1 %v2242_v37 }
  0xae   :  { %1520 = vmatprep.subr.bf16.mxu0 %v2241_v36 }
  0xb0   :  { %1995 = vmatpush3.bf16.msra.mxu1 %v2243_v39 }
  0xb1   :  { %1521 = vmatpush1.bf16.msra.mxu0 %v2239_v38  ;;  %1996 = vmatprep.subr.bf16.mxu1 %v2247_v40  ;;  %v364_v40 = vsub.s32 2, %v2439_v43 }
  0xb2   :  { %1522 = vmatprep.subr.bf16.mxu0 %v2246_v18 }
  0xb4   :  { %1997 = vmatpush3.bf16.msra.mxu1 %v2248_v42 }
  0xb5   :  { %1523 = vmatpush1.bf16.msra.mxu0 %v2244_v41  ;;  %1998 = vmatprep.subr.bf16.mxu1 %v2252_v45  ;;  %v352_v41 = vld [vmem:[%s2506_s2] sm:$0x7]  ;;  %s2387_s2 = smov [#allocation7]  }
  0xb6   :  { %1524 = vmatprep.subr.bf16.mxu0 %v2251_v44  ;;  %v365_v22 = vrot.slane %v352_v41, %v364_v40  ;;  %s1744_s11 = sshll.u32 %s2387_s2, 4  ;;  %s1745_s11 = int_to_ptr.vmem [resolvable:$true] %s1744_s11 }
  0xb7   :  { %s2354_s12 = scalar_lea.vmem %s1745_s11, 96  ;;  %p2359_p3 = scmp.lt.s32.totalorder %s1745_s11, %s1745_s11 }
  0xb8   :  { %1999 = vmatpush3.bf16.msra.mxu1 %v2253_v47  ;;  %p2355_p2 = scmp.ne.s32.totalorder %s1745_s11, %s2354_s12  ;;  %p2360_p4 = scmp.lt.s32.totalorder %s2354_s12, %s2354_s12 }
  0xb9   :  { %1525 = vmatpush1.bf16.msra.mxu0 %v2249_v46  ;;  %2000 = vmatprep.subr.bf16.mxu1 %v2257_v50 }
  0xba   :  { %1526 = vmatprep.subr.bf16.mxu0 %v2256_v48  ;;  %p2361_p5 = por %p2360_p4, %p2359_p3 }
  0xbc   :  { %2001 = vmatpush3.bf16.msra.mxu1 %v2258_v52  ;;  %p2362_p6 = pnand %p2361_p5, %p2355_p2 }
  0xbd   :  { %1527 = vmatpush1.bf16.msra.mxu0 %v2254_v51  ;;  %2002 = vmatprep.subr.bf16.mxu1 %v2262_v54 }
  0xbe   :  { %1528 = vmatprep.subr.bf16.mxu0 %v2261_v53 }
  0xc0   :  { %2003 = vmatpush3.bf16.msra.mxu1 %v2263_v56 }
  0xc1   :  { %1529 = vmatpush1.bf16.msra.mxu0 %v2259_v55  ;;  %2004 = vmatprep.subr.bf16.mxu1 %v2267_v58  ;;  %v360_v58 = vsub.s32 1, %v2439_v43 }
  0xc2   :  { %1530 = vmatprep.subr.bf16.mxu0 %v2266_v57  ;;  %v356_v57 = vsub.s32 0, %v2439_v43 }
  0xc4   :  { %2005 = vmatpush3.bf16.msra.mxu1 %v2268_v60  ;;  %v361_v60 = vrot.slane %v352_v41, %v360_v58 }
  0xc5   :  { %1531 = vmatpush1.bf16.msra.mxu0 %v2264_v59  ;;  %2012 = vmatprep.subr.bf16.mxu1 %v2272_v62  ;;  %v357_v59 = vrot.slane %v352_v41, %v356_v57 }
  0xc6   :  { %1532 = vmatprep.subr.bf16.mxu0 %v2271_v61 }
  0xc7   :  { %1670 = vmatmul.mubr.bf16.vlgmr.msra.gmra.mrb[12].mxu1 %v2472_v29  ;;  %v2304_v29 = vld [vmem:[#allocation5 + $0x5e8] ss:$12 sps:$4 sm:$0xff]  }
  0xc8   :  { %2013 = vmatpush3.bf16.msra.mxu1 %v2273_v0  ;;  %1709 = vmatprep.mubr.bf16.mxu1 %v2474_v34 }
  0xc9   :  { %1533 = vmatpush1.bf16.msra.mxu0 %v2269_v63  ;;  %2014 = vmatprep.subr.bf16.mxu1 %v2277_v2 }
  0xca   :  { %1534 = vmatprep.subr.bf16.mxu0 %v2276_v1 }
  0xcc   :  { %2015 = vmatpush3.bf16.msra.mxu1 %v2278_v5 }
  0xcd   :  { %1535 = vmatpush1.bf16.msra.mxu0 %v2274_v4  ;;  %2016 = vmatprep.subr.bf16.mxu1 %v2282_v7 }
  0xce   :  { %1536 = vmatprep.subr.bf16.mxu0 %v2281_v6 }
  0xd0   :  { %2017 = vmatpush3.bf16.msra.mxu1 %v2283_v9 }
  0xd1   :  { %1537 = vmatpush1.bf16.msra.mxu0 %v2279_v8  ;;  %2018 = vmatprep.subr.bf16.mxu1 %v2287_v10 }
  0xd2   :  { %1538 = vmatprep.subr.bf16.mxu0 %v2286_v3 }
  0xd4   :  { %2019 = vmatpush3.bf16.msra.mxu1 %v2288_v12 }
  0xd5   :  { %1539 = vmatpush1.bf16.msra.mxu0 %v2284_v11  ;;  %2020 = vmatprep.subr.bf16.mxu1 %v2292_v14 }
  0xd6   :  { %1540 = vmatprep.subr.bf16.mxu0 %v2291_v13 }
  0xd8   :  { %2021 = vmatpush3.bf16.msra.mxu1 %v2293_v16 }
  0xd9   :  { %1541 = vmatpush1.bf16.msra.mxu0 %v2289_v15  ;;  %2022 = vmatprep.subr.bf16.mxu1 %v2297_v19 }
  0xda   :  { %1542 = vmatprep.subr.bf16.mxu0 %v2296_v17 }
  0xdc   :  { %2023 = vmatpush3.bf16.msra.mxu1 %v2298_v21 }
  0xdd   :  { %1543 = vmatpush1.bf16.msra.mxu0 %v2294_v20  ;;  %2024 = vmatprep.subr.bf16.mxu1 %v2302_v24 }
  0xde   :  { %1544 = vmatprep.subr.bf16.mxu0 %v2301_v23 }
  0xe0   :  { %2025 = vmatpush3.bf16.msra.mxu1 %v2303_v26 }
  0xe1   :  { %1545 = vmatpush1.bf16.msra.mxu0 %v2299_v25  ;;  %2026 = vmatprep.subr.bf16.mxu1 %v2307_v28 }
  0xe2   :  { %1546 = vmatprep.subr.bf16.mxu0 %v2306_v27 }
  0xe4   :  { %2027 = vmatpush3.bf16.msra.mxu1 %v2308_v30 }
  0xe5   :  { %1547 = vmatpush1.bf16.msra.mxu0 %v2304_v29 }
  0xe7   :  { %1710 = vmatmul.mubr.bf16.vlgmr.msra.gmra.mrb[16].mxu1 %v94_v31 }
  0xe8   :  { %1549 = vmatmul.mubr.bf16.vlgmr.msra.gmra.mrb[0].mxu0 %v94_v31 }
 0x13a   :  { %v1427_v32 = vpop.f32.mrb[0].mxu1 }
 0x13b   :  { %v1429_v33 = vpop.f32.mrb[1].mxu1  ;;  %v1428_v61 = vadd.f32 %v1427_v32, %v357_v59 }
 0x13c   :  { %v1431_v34 = vpop.f32.mrb[2].mxu1  ;;  %v1430_v62 = vadd.f32 %v1429_v33, %v361_v60 }
 0x13d   :  { %v1432_v35 = vpop.f32.mrb[3].mxu1 }
 0x15a   :  { %v1962_v36 = vpop.f32.mrb[4].mxu1 }
 0x15b   :  { %v1963_v37 = vpop.f32.mrb[5].mxu1 }
 0x15c   :  { %v1964_v38 = vadd.f32 %v1963_v37, %v1962_v36  ;;  %v1965_v39 = vpop.f32.mrb[6].mxu1 }
 0x15d   :  { %v1966_v18 = vpop.f32.mrb[7].mxu1 }
 0x15e   :  { %v1592_v45 = vadd.f32 %v1964_v38, %v365_v22 }
 0x17a   :  { %v1984_v42 = vpop.f32.mrb[8].mxu1 }
 0x17b   :  { %v1985_v44 = vpop.f32.mrb[9].mxu1 }
 0x17c   :  { %v1986_v46 = vadd.f32 %v1985_v44, %v1984_v42  ;;  %v1987_v47 = vpop.f32.mrb[10].mxu1 }
 0x17d   :  { %v1988_v48 = vpop.f32.mrb[11].mxu1 }
 0x17e   :  { %v1632_v50 = vadd.f32 %v1986_v46, %v1592_v45 }
 0x19a   :  { %v2006_v51 = vpop.f32.mrb[12].mxu1 }
 0x19b   :  { %v2007_v52 = vpop.f32.mrb[13].mxu1 }
 0x19c   :  { %v2008_v53 = vadd.f32 %v2007_v52, %v2006_v51  ;;  %v2009_v54 = vpop.f32.mrb[14].mxu1 }
 0x19d   :  { %v2010_v55 = vpop.f32.mrb[15].mxu1 }
 0x19e   :  { %v1672_v56 = vadd.f32 %v2008_v53, %v1632_v50 }
 0x1ba   :  { %v2028_v0 = vpop.f32.mrb[16].mxu1 }
 0x1bb   :  { %v1550_v63 = vpop.f32.mrb[0].mxu0  ;;  %v2029_v4 = vpop.f32.mrb[17].mxu1 }
 0x1bc   :  { %v2035_v1 = vadd.f32 %v1550_v63, %v1428_v61  ;;  %v1552_v2 = vpop.f32.mrb[1].mxu0  ;;  %v2030_v6 = vadd.f32 %v2029_v4, %v2028_v0  ;;  %v2031_v8 = vpop.f32.mrb[18].mxu1 }
 0x1bd   :  { %v2037_v5 = vadd.f32 %v1552_v2, %v1430_v62  ;;  %v1554_v7 = vpop.f32.mrb[2].mxu0  ;;  %v2032_v3 = vpop.f32.mrb[19].mxu1 }
 0x1be   :  { %v1555_v9 = vpop.f32.mrb[3].mxu0  ;;  %v1712_v11 = vadd.f32 %v2030_v6, %v1672_v56 }
 0x1bf   :  { %v1720_v10 = vcombine.low %v2035_v1, %v2037_v5 }
 0x1c0   :  { %v1734_v12 = vrot.slane %v1712_v11, %v2442_v49 }
 0x1c1   :  { %v1727_v43 = vrot.slane %v1720_v10, %v2442_v49 }
 0x1c3   :  { %v1735_v13 = vcombine.low %v1727_v43, %v1734_v12 }
 0x1c5   :  { %1737 = vst [vmem:[#allocation7] sm:$0x3f] %v1735_v13 }
 0x1c6   :  { %2365 = shalt.err (!%p2362_p6)
}
 0x1c7   :  { %s2366_s15 = scalar_lea.hbm %s2507_s3, 96 }
 0x1c8   :  { %p2367_p7 = scmp.ne.s32.totalorder %s2507_s3, %s2366_s15  ;;  %p2370_p8 = scmp.lt.u32.totalorder %s2366_s15, %s2507_s3 }
 0x1ca   :  { %p2372_p9 = pnand %p2370_p8, %p2367_p7 }
 0x1cc   :  { %2375 = shalt.err (!%p2372_p9)
}
 0x1cd   :  { %1747 = dma.vmem_to_hbm [thread:$0]  %s1745_s11, 96, %s2507_s3, [#allocation4]  }
 0x1ce   :  { %2380 = dma.done.wait [#allocation4], 96  }
 0x1cf   :  { %2381 = vsyncadd [#allocation4], 4294967200 }
 0x1d0   :  { %1751 = vsyncpa [#allocation3], 1 }
 0x1d1   :  { %1752 = vsyncpa [#allocation6], 1 }
 0x1d2   :  { %1753 = vsyncpa [#allocation4], 1 }

</bundles_post_ra>
